<compile_context>
chip_gen: v7x
topology: tpu7x:2x2x1
jax: 0.10.0
libtpu: 0.0.40
codegen_flags: <defaults>
</compile_context>

<pallas_src>
import jax
import jax.numpy as jnp
import numpy as np
from jax.experimental import pallas as pl
from jax.experimental.pallas import tpu as pltpu


def residual_block_kernel(x_ref, a_ref, wa_ref, sha_ref, w3_ref, sh_ref, out_ref):
    # x_ref:   (1, H, W*C)      lane-dense activations (128 lanes)
    # a_ref:   (1, H, W*Ca)     lane-dense auxiliary input
    # wa_ref:  (W*Ca, W*C)      block-diagonal 1x1 weight, BN_a scale folded in
    # sha_ref: (1, W*C)         BN_a shift, tiled across W
    # w3_ref:  (2*W*C, 3*W*C)   banded 3x3 weight (kh = 0,1,2 column blocks), BN scale folded in
    # sh_ref:  (1, W*C)         BN shift, tiled across W
    # out_ref: (1, H, W*C)
    H, WC = x_ref.shape[1], x_ref.shape[2]

    x = x_ref[0]                                                   # (H, W*C)

    # conv_a: ReLU(a) -> 1x1 conv -> folded BatchNorm_a, all lane-dense.
    a_act = jnp.maximum(a_ref[0], 0.0)                             # (H, W*Ca)
    am = jnp.dot(a_act, wa_ref[...],
                 preferred_element_type=jnp.float32) + sha_ref[...]

    # conv input: [ReLU(x) | ReLU(a_map)] lane-concatenated (tile-aligned, no relayout).
    r = jnp.concatenate([jnp.maximum(x, 0.0), jnp.maximum(am, 0.0)], axis=-1)  # (H, 2*W*C)

    # 3x3 conv (padding=1) + folded BN scale as a single banded matmul.
    q = jnp.dot(r, w3_ref[...], preferred_element_type=jnp.float32)            # (H, 3*W*C)

    # Combine the three kh column blocks; the sublane shifts implement the
    # vertical zero-padding (row -1 / row H are zero).
    zrow = jnp.zeros((1, WC), jnp.float32)
    top = jnp.concatenate([zrow, q[:H - 1, 0:WC]], axis=0)          # r[h-1] @ W_kh0
    mid = q[:, WC:2 * WC]                                           # r[h]   @ W_kh1
    bot = jnp.concatenate([q[1:, 2 * WC:3 * WC], zrow], axis=0)     # r[h+1] @ W_kh2

    # folded BN shift + residual add, fully lane-dense store.
    out_ref[0] = x + top + mid + bot + sh_ref[...]
    # TODO(synk): F.dropout (use_dropout=True) not implemented; module default is False.


def _fold_weights(wa, sa, sha, w3, s, sh, W, C, Ca):
    """Precompute lane-dense matmul weights with the BatchNorm scales folded in."""
    wa = np.asarray(wa, np.float32) * np.asarray(sa, np.float32)[None, :]          # (Ca, C)
    w3 = np.asarray(w3, np.float32) * np.asarray(s, np.float32)[None, None, None, :]  # (3,3,2C,C)
    WC, WCa = W * C, W * Ca

    # Block-diagonal 1x1 weight mapping lane-dense a -> lane-dense a_map.
    wa_big = np.zeros((WCa, WC), np.float32)
    for w in range(W):
        wa_big[w * Ca:(w + 1) * Ca, w * C:(w + 1) * C] = wa

    # Banded 3x3 weight.  Rows index the lane-dense conv input
    # [x part: w_in*C+ci | a part: W*C + w_in*C+ci]; column block kh holds the
    # contribution of input row (h + kh - 1) to output row h, with the kw taps
    # and horizontal zero-padding encoded in the band structure.
    w3_big = np.zeros((2 * WC, 3 * WC), np.float32)
    for kh in range(3):
        for w in range(W):                      # output pixel
            for kw in range(3):
                w_in = w + kw - 1               # input pixel; out of range == zero pad
                if 0 <= w_in < W:
                    blk = w3[kh, kw]            # (2C, C)
                    col = kh * WC + w * C
                    w3_big[w_in * C:(w_in + 1) * C, col:col + C] = blk[:C]
                    w3_big[WC + w_in * C:WC + (w_in + 1) * C, col:col + C] = blk[C:]

    sha_t = np.tile(np.asarray(sha, np.float32), W).reshape(1, WC)
    sh_t = np.tile(np.asarray(sh, np.float32), W).reshape(1, WC)
    return (jnp.asarray(wa_big), jnp.asarray(sha_t),
            jnp.asarray(w3_big), jnp.asarray(sh_t))


def residual_block(x, a, wa, sa, sha, w3, s, sh):
    N, H, W, C = x.shape
    Ca = a.shape[-1]
    WC, WCa = W * C, W * Ca

    wa_big, sha_t, w3_big, sh_t = _fold_weights(wa, sa, sha, w3, s, sh, W, C, Ca)

    # Present activations lane-dense: (N, H, W*C) so the last dim is a multiple of 128.
    x_d = x.reshape(N, H, WC)
    a_d = a.reshape(N, H, WCa)

    grid_spec = pltpu.PrefetchScalarGridSpec(
        num_scalar_prefetch=0,
        grid=(N,),  # one image per step; batch elements are independent (-> parallel)
        in_specs=[
            pl.BlockSpec((1, H, WC), lambda n: (n, 0, 0)),        # x, lane-dense
            pl.BlockSpec((1, H, WCa), lambda n: (n, 0, 0)),       # a, lane-dense
            pl.BlockSpec((WCa, WC), lambda n: (0, 0)),            # block-diag 1x1 weight
            pl.BlockSpec((1, WC), lambda n: (0, 0)),              # bn_a shift (tiled)
            pl.BlockSpec((2 * WC, 3 * WC), lambda n: (0, 0)),     # banded 3x3 weight
            pl.BlockSpec((1, WC), lambda n: (0, 0)),              # bn shift (tiled)
        ],
        out_specs=pl.BlockSpec((1, H, WC), lambda n: (n, 0, 0)),
    )

    out = pl.pallas_call(
        residual_block_kernel,
        out_shape=jax.ShapeDtypeStruct((N, H, WC), jnp.float32),
        grid_spec=grid_spec,
        compiler_params=pltpu.CompilerParams(
            dimension_semantics=("parallel",)),
    )(x_d, a_d, wa_big, sha_t, w3_big, sh_t)
    return out.reshape(N, H, W, C)


if __name__ == "__main__":
    key = jax.random.PRNGKey(0)
    N, H, W = 2, 16, 16
    dim, dim_a = 8, 4          # ResidualBlock(dim=8, dim_a=4)
    eps = 1e-5
    ks = jax.random.split(key, 12)

    x = jax.random.normal(ks[0], (N, H, W, dim), jnp.float32)
    a = jax.random.normal(ks[1], (N, H, W, dim_a), jnp.float32)

    # conv_a: Conv2d(dim_a, dim, 1, bias=False) weight stored as (Cin, Cout)
    wa = 0.2 * jax.random.normal(ks[2], (dim_a, dim), jnp.float32)
    # BatchNorm2d(dim) params / running stats (eval mode), folded to scale/shift
    g_a = 1.0 + 0.1 * jax.random.normal(ks[3], (dim,), jnp.float32)
    b_a = 0.1 * jax.random.normal(ks[4], (dim,), jnp.float32)
    m_a = 0.1 * jax.random.normal(ks[5], (dim,), jnp.float32)
    v_a = jnp.abs(jax.random.normal(ks[6], (dim,), jnp.float32)) + 0.5
    sa = g_a / jnp.sqrt(v_a + eps)
    sha = b_a - m_a * sa

    # conv: Conv2d(2*dim, dim, 3, padding=1, bias=False) weight in HWIO layout
    w3 = 0.1 * jax.random.normal(ks[7], (3, 3, 2 * dim, dim), jnp.float32)
    g = 1.0 + 0.1 * jax.random.normal(ks[8], (dim,), jnp.float32)
    b = 0.1 * jax.random.normal(ks[9], (dim,), jnp.float32)
    m = 0.1 * jax.random.normal(ks[10], (dim,), jnp.float32)
    v = jnp.abs(jax.random.normal(ks[11], (dim,), jnp.float32)) + 0.5
    s = g / jnp.sqrt(v + eps)
    sh = b - m * s

    out = jax.block_until_ready(residual_block(x, a, wa, sa, sha, w3, s, sh))

    # pure-JAX reference (same math, XLA conv)
    a_map = jnp.einsum('nhwc,cd->nhwd', jnp.maximum(a, 0.0), wa) * sa + sha
    r = jnp.concatenate([jnp.maximum(x, 0.0), jnp.maximum(a_map, 0.0)], axis=-1)
    conv = jax.lax.conv_general_dilated(
        r, w3, window_strides=(1, 1), padding=((1, 1), (1, 1)),
        dimension_numbers=('NHWC', 'HWIO', 'NHWC'))
    ref = x + (conv * s + sh)

    err = float(jnp.max(jnp.abs(out - ref)))
    assert jnp.allclose(out, ref, atol=1e-3, rtol=1e-3), err
    print("KERNEL_OK")
</pallas_src>

<mosaic_0001>
module attributes {stable_mosaic.version = 11 : i64} {
  func.func @residual_block_kernel(%arg0: i32, %arg1: memref<1x16x128xf32, #tpu.memory_space<vmem>>, %arg2: memref<1x16x64xf32, #tpu.memory_space<vmem>>, %arg3: memref<64x128xf32, #tpu.memory_space<vmem>>, %arg4: memref<1x128xf32, #tpu.memory_space<vmem>>, %arg5: memref<256x384xf32, #tpu.memory_space<vmem>>, %arg6: memref<1x128xf32, #tpu.memory_space<vmem>>, %arg7: memref<1x16x128xf32, #tpu.memory_space<vmem>>) attributes {dimension_semantics = [#tpu.dimension_semantics<parallel>], iteration_bounds = array<i64: 2>, scalar_prefetch = 0 : i64, scratch_operands = 0 : i64, tpu.core_type = #tpu.core_type<tc>, window_params = [{transform_indices = @transform_0, window_bounds = array<i64: 1, 16, 128>}, {transform_indices = @transform_1, window_bounds = array<i64: 1, 16, 64>}, {pipeline_mode = #tpu.pipeline_mode<synchronous>, transform_indices = @transform_2, window_bounds = array<i64: 64, 128>}, {pipeline_mode = #tpu.pipeline_mode<synchronous>, transform_indices = @transform_3, window_bounds = array<i64: 1, 128>}, {pipeline_mode = #tpu.pipeline_mode<synchronous>, transform_indices = @transform_4, window_bounds = array<i64: 256, 384>}, {pipeline_mode = #tpu.pipeline_mode<synchronous>, transform_indices = @transform_5, window_bounds = array<i64: 1, 128>}, {transform_indices = @transform_6, window_bounds = array<i64: 1, 16, 128>}]} {
    %c0 = arith.constant 0 : index
    %c0_0 = arith.constant 0 : index
    %c0_1 = arith.constant 0 : index
    %0 = vector.load %arg1[%c0, %c0_0, %c0_1] : memref<1x16x128xf32, #tpu.memory_space<vmem>>, vector<1x16x128xf32>
    %1 = vector.shape_cast %0 : vector<1x16x128xf32> to vector<16x128xf32>
    %c0_2 = arith.constant 0 : index
    %c0_3 = arith.constant 0 : index
    %c0_4 = arith.constant 0 : index
    %2 = vector.load %arg2[%c0_2, %c0_3, %c0_4] : memref<1x16x64xf32, #tpu.memory_space<vmem>>, vector<1x16x64xf32>
    %3 = vector.shape_cast %2 : vector<1x16x64xf32> to vector<16x64xf32>
    %cst = arith.constant 0.000000e+00 : f32
    %4 = vector.broadcast %cst : f32 to vector<16x64xf32>
    %5 = arith.maximumf %3, %4 : vector<16x64xf32>
    %c0_5 = arith.constant 0 : index
    %c0_6 = arith.constant 0 : index
    %6 = vector.load %arg3[%c0_5, %c0_6] : memref<64x128xf32, #tpu.memory_space<vmem>>, vector<64x128xf32>
    %cst_7 = arith.constant dense<0.000000e+00> : vector<16x128xf32>
    %7 = tpu.matmul %5, %6, %cst_7 {dimension_numbers = #tpu.dot_dimension_numbers<[1], [0], [0], [1], [0, 0, 1, 1], [], []>} : vector<16x64xf32>, vector<64x128xf32>, vector<16x128xf32> -> vector<16x128xf32>
    %c0_8 = arith.constant 0 : index
    %c0_9 = arith.constant 0 : index
    %8 = vector.load %arg4[%c0_8, %c0_9] : memref<1x128xf32, #tpu.memory_space<vmem>>, vector<1x128xf32>
    %9 = vector.broadcast %8 : vector<1x128xf32> to vector<16x128xf32>
    %10 = arith.addf %7, %9 : vector<16x128xf32>
    %cst_10 = arith.constant 0.000000e+00 : f32
    %11 = vector.broadcast %cst_10 : f32 to vector<16x128xf32>
    %12 = arith.maximumf %1, %11 : vector<16x128xf32>
    %cst_11 = arith.constant 0.000000e+00 : f32
    %13 = vector.broadcast %cst_11 : f32 to vector<16x128xf32>
    %14 = arith.maximumf %10, %13 : vector<16x128xf32>
    %15 = tpu.concatenate %12, %14 in 1 : vector<16x128xf32>, vector<16x128xf32> -> vector<16x256xf32>
    %c0_12 = arith.constant 0 : index
    %c0_13 = arith.constant 0 : index
    %16 = vector.load %arg5[%c0_12, %c0_13] : memref<256x384xf32, #tpu.memory_space<vmem>>, vector<256x384xf32>
    %cst_14 = arith.constant dense<0.000000e+00> : vector<16x384xf32>
    %17 = tpu.matmul %15, %16, %cst_14 {dimension_numbers = #tpu.dot_dimension_numbers<[1], [0], [0], [1], [0, 0, 1, 1], [], []>} : vector<16x256xf32>, vector<256x384xf32>, vector<16x384xf32> -> vector<16x384xf32>
    %cst_15 = arith.constant 0.000000e+00 : f32
    %18 = vector.broadcast %cst_15 : f32 to vector<1x128xf32>
    %19 = vector.extract_strided_slice %17 {offsets = [0, 0], sizes = [15, 128], strides = [1, 1]} : vector<16x384xf32> to vector<15x128xf32>
    %20 = tpu.concatenate %18, %19 in 0 : vector<1x128xf32>, vector<15x128xf32> -> vector<16x128xf32>
    %21 = vector.extract_strided_slice %17 {offsets = [0, 128], sizes = [16, 128], strides = [1, 1]} : vector<16x384xf32> to vector<16x128xf32>
    %22 = vector.extract_strided_slice %17 {offsets = [1, 256], sizes = [15, 128], strides = [1, 1]} : vector<16x384xf32> to vector<15x128xf32>
    %23 = tpu.concatenate %22, %18 in 0 : vector<15x128xf32>, vector<1x128xf32> -> vector<16x128xf32>
    %24 = arith.addf %1, %20 : vector<16x128xf32>
    %25 = arith.addf %24, %21 : vector<16x128xf32>
    %26 = arith.addf %25, %23 : vector<16x128xf32>
    %c0_16 = arith.constant 0 : index
    %c0_17 = arith.constant 0 : index
    %27 = vector.load %arg6[%c0_16, %c0_17] : memref<1x128xf32, #tpu.memory_space<vmem>>, vector<1x128xf32>
    %28 = vector.broadcast %27 : vector<1x128xf32> to vector<16x128xf32>
    %29 = arith.addf %26, %28 : vector<16x128xf32>
    %c0_18 = arith.constant 0 : index
    %c0_19 = arith.constant 0 : index
    %c0_20 = arith.constant 0 : index
    %30 = vector.load %arg7[%c0_18, %c0_19, %c0_20] : memref<1x16x128xf32, #tpu.memory_space<vmem>>, vector<1x16x128xf32>
    %31 = vector.shape_cast %30 : vector<1x16x128xf32> to vector<16x128xf32>
    %32 = vector.shape_cast %29 : vector<16x128xf32> to vector<1x16x128xf32>
    tpu.vector_store %arg7[%c0_18, %c0_19, %c0_20], %32 {strides = array<i32>} : memref<1x16x128xf32, #tpu.memory_space<vmem>>, vector<1x16x128xf32>,
    return
  }
  func.func @transform_0(%arg0: i32) -> (i32, i32, i32) {
    %c0_i32 = arith.constant 0 : i32
    %c0_i32_0 = arith.constant 0 : i32
    %c0_i32_1 = arith.constant 0 : i32
    return %arg0, %c0_i32, %c0_i32_0 : i32, i32, i32
  }
  func.func @transform_1(%arg0: i32) -> (i32, i32, i32) {
    %c0_i32 = arith.constant 0 : i32
    %c0_i32_0 = arith.constant 0 : i32
    %c0_i32_1 = arith.constant 0 : i32
    return %arg0, %c0_i32, %c0_i32_0 : i32, i32, i32
  }
  func.func @transform_2(%arg0: i32) -> (i32, i32) {
    %c0_i32 = arith.constant 0 : i32
    %c0_i32_0 = arith.constant 0 : i32
    %c0_i32_1 = arith.constant 0 : i32
    return %c0_i32, %c0_i32_0 : i32, i32
  }
  func.func @transform_3(%arg0: i32) -> (i32, i32) {
    %c0_i32 = arith.constant 0 : i32
    %c0_i32_0 = arith.constant 0 : i32
    %c0_i32_1 = arith.constant 0 : i32
    return %c0_i32, %c0_i32_0 : i32, i32
  }
  func.func @transform_4(%arg0: i32) -> (i32, i32) {
    %c0_i32 = arith.constant 0 : i32
    %c0_i32_0 = arith.constant 0 : i32
    %c0_i32_1 = arith.constant 0 : i32
    return %c0_i32, %c0_i32_0 : i32, i32
  }
  func.func @transform_5(%arg0: i32) -> (i32, i32) {
    %c0_i32 = arith.constant 0 : i32
    %c0_i32_0 = arith.constant 0 : i32
    %c0_i32_1 = arith.constant 0 : i32
    return %c0_i32, %c0_i32_0 : i32, i32
  }
  func.func @transform_6(%arg0: i32) -> (i32, i32, i32) {
    %c0_i32 = arith.constant 0 : i32
    %c0_i32_0 = arith.constant 0 : i32
    %c0_i32_1 = arith.constant 0 : i32
    return %arg0, %c0_i32, %c0_i32_0 : i32, i32, i32
  }
}

</mosaic_0001>

<bundles_post_ra>
// kernel: tpu_custom_call.1
= control target key start
LH: loop header
LB: loop body
LE: loop exit
PB: predicated region body
PF: predicated region fallthrough
CT: control target
= control target key end

     0   :  { %s1696_s0 = inlined_call_operand.hbm [shape: f32[2,16,128], index: 0, kind: input, shape index: {}]   ;;  %s1697_s1 = inlined_call_operand.hbm [shape: f32[2,16,64], index: 1, kind: input, shape index: {}]   ;;  %s1698_s2 = inlined_call_operand.hbm [shape: f32[64,128], index: 2, kind: input, shape index: {}]   ;;  %s1699_s3 = inlined_call_operand.vmem [shape: f32[1,128], index: 3, kind: input, shape index: {}]   ;;  %s1700_s4 = inlined_call_operand.hbm [shape: f32[256,384], index: 4, kind: input, shape index: {}]   ;;  %s1701_s5 = inlined_call_operand.vmem [shape: f32[1,128], index: 5, kind: input, shape index: {}]   ;;  %s1702_s6 = inlined_call_operand.hbm [shape: f32[2,16,128], index: 6, kind: output, shape index: {}]  }
   0x1   :  { %1710 = sst [smem:[#allocation16_spill]] %s1696_s0 }
   0x2   :  { %1711 = sst [smem:[#allocation17_spill]] %s1698_s2 }
   0x3   :  { %1712 = sst [smem:[#allocation18_spill]] %s1700_s4 }
   0x4   :  { %11 = vsyncpa [#allocation3], 0 }
   0x5   :  { %13 = vsyncpa [#allocation3 + $0x1], 0 }
   0x6   :  { %14 = vsyncpa [#allocation6], 0 }
   0x7   :  { %16 = vsyncpa [#allocation6 + $0x1], 0 }
   0x8   :  { %17 = vsyncpa [#allocation9], 0 }
   0x9   :  { %18 = vsyncpa [#allocation4], 0 }
   0xa   :  { %20 = vsyncpa [#allocation4 + $0x1], 0  ;;  %s1386_s21 = smov 0   ;;  %s1388_s22 = smov 0  }
   0xb   :  { %s1390_s23 = smov 0   ;;  %s1392_s24 = smov 0  }
   0xc LB: > { %s1407_s25 = sadd.s32 4294967295, %s1338_s24   ;;  %s858_s26 = sadd.s32 4294967294, %s1338_s24   ;;  %s1338_s24 = sphi %s1392_s24, %s1736_s24   ;;  %s1334_s23 = sphi %s1390_s23, %s1735_s23   ;;  %s1330_s22 = sphi %s1388_s22, %s1734_s22   ;;  %s1326_s21 = sphi %s1386_s21, %s1733_s21  }
   0xd   : > { %p46_p0 = scmp.ne.s32.totalorder %s1330_s22, %s1326_s21  ;;  %p1703_p1 = scmp.eq.s32.totalorder %s1407_s25, 0 }
   0xe   : > { %p186_p3 = scmp.eq.s32.totalorder %s858_s26, 1  ;;  %p859_p5 = scmp.ge.s32.totalorder %s1338_s24, 1 }
   0xf   : > { %p1416_p4 = por %p1703_p1, %p46_p0  ;;  %p193_p7 = scmp.lt.s32.totalorder %s1338_s24, 3 }
  0x10   : > { %p1421_p6 = por %p186_p3, %p46_p0  ;;  %s1340_s30 = smov [#allocation7]  }
  0x11   : > { %s1713_s27 = scalar_select %p1416_p4, 1, 0 }
  0x12   : > { %s1714_s28 = scalar_select %p1421_p6, 1, 0 }
  0x13   : > { %p1426_p8 = pnand %p859_p5, %p193_p7  ;;  %s205_s7 = sshll.u32 %s1340_s30, 4  ;;  %s1430_s7 = int_to_ptr.vmem [resolvable:$true] %s205_s7 }
  0x14   : > { %s1341_s9 = smov [#allocation8]   ;;  %s1717_s2 = sld [smem:[#allocation17_spill]] }
  0x15   : > { %p1080_p9 = pneg %p1426_p8  ;;  %s221_s10 = sshll.u32 %s1341_s9, 4  ;;  %s1441_s10 = int_to_ptr.vmem [resolvable:$true] %s221_s10 }
  0x17   : > { %p1437_p11 = pnand %p1080_p9, %p1703_p1 }
  0x19   : > { %p1146_p13 = pneg %p1437_p11 }
  0x1a   : > { %s1144_s13 = scalar_lea.hbm %s1717_s2, 1024 }
  0x1b   : > { %p1145_p12 = scmp.ne.s32.totalorder %s1717_s2, %s1144_s13  ;;  %p1151_p5 = scmp.lt.u32.totalorder %s1144_s13, %s1717_s2 }
  0x1d   : > { %p1147_p0 = pnand %p1146_p13, %p1145_p12 }
  0x1f   : > { %p1148_p3 = pneg %p1147_p0 }
  0x21   : > { %p1153_p7 = pnand %p1151_p5, %p1148_p3 }
  0x23   : > { %1156 = shalt.err (!%p1153_p7)
}
  0x24   : > { %s1157_s18 = scalar_lea.vmem %s1430_s7, 1024  ;;  %p1165_p2 = scmp.lt.s32.totalorder %s1430_s7, %s1430_s7 }
  0x25   : > { %p1158_p9 = scmp.ne.s32.totalorder %s1430_s7, %s1157_s18  ;;  %p1166_p12 = scmp.lt.s32.totalorder %s1157_s18, %s1157_s18 }
  0x27   : > { %p1160_p10 = pnand %p1158_p9, %p1146_p13  ;;  %p1167_p0 = por %p1166_p12, %p1165_p2 }
  0x29   : > { %p1161_p1 = pneg %p1160_p10 }
  0x2b   : > { %p1168_p6 = pnand %p1167_p0, %p1161_p1 }
  0x2d   : > { %1171 = shalt.err (!%p1168_p6)
}
  0x2e   : > { %s1704_s19 = smov 128   ;;  %s1706_s20 = smov 8  }
  0x2f   : > { %1083 = dma.hbm_to_vmem [thread:$0]  (!%p1437_p11), %s1717_s2, 1024, %s1430_s7, [#allocation6], %s1704_s19, %s1704_s19, %s1706_s20  }
  0x30   : > { %s1718_s4 = sld [smem:[#allocation18_spill]] }
  0x36   : > { %s1172_s12 = scalar_lea.hbm %s1718_s4, 12288 }
  0x37   : > { %p1173_p1 = scmp.ne.s32.totalorder %s1718_s4, %s1172_s12  ;;  %p1179_p10 = scmp.lt.u32.totalorder %s1172_s12, %s1718_s4 }
  0x39   : > { %p1175_p2 = pnand %p1173_p1, %p1146_p13 }
  0x3b   : > { %p1176_p6 = pneg %p1175_p2 }
  0x3d   : > { %p1181_p3 = pnand %p1179_p10, %p1176_p6 }
  0x3f   : > { %1184 = shalt.err (!%p1181_p3)
}
  0x40   : > { %s1185_s7 = scalar_lea.vmem %s1441_s10, 12288  ;;  %p1193_p12 = scmp.lt.s32.totalorder %s1441_s10, %s1441_s10 }
  0x41   : > { %p1186_p5 = scmp.ne.s32.totalorder %s1441_s10, %s1185_s7  ;;  %p1194_p0 = scmp.lt.s32.totalorder %s1185_s7, %s1185_s7 }
  0x43   : > { %p1188_p7 = pnand %p1186_p5, %p1146_p13  ;;  %p1195_p1 = por %p1194_p0, %p1193_p12 }
  0x45   : > { %p1189_p9 = pneg %p1188_p7 }
  0x47   : > { %p1196_p2 = pnand %p1195_p1, %p1189_p9 }
  0x49   : > { %1199 = shalt.err (!%p1196_p2)
}
  0x4a   : > { %s1344_s17 = smov 384   ;;  %s1345_s18 = smov 24  }
  0x4b   : > { %1086 = dma.hbm_to_vmem [thread:$0]  (!%p1437_p11), %s1718_s4, 12288, %s1441_s10, [#allocation9], %s1344_s17, %s1344_s17, %s1345_s18  }
  0x4c   : > { %s1499_s9 = sadd.s32 1, %s1338_s24   ;;  %s33_s12 = sadd.s32 1, %s1334_s23 }
  0x4d   : > { %s30_s11 = ssub.s32 %s1338_s24, %s1499_s9  ;;  %p40_p6 = scmp.ne.s32.totalorder %s1334_s23, %s1330_s22 }
  0x4e   : > { %p31_p13 = scmp.eq.s32.totalorder %s30_s11, 0  ;;  %p41_p10 = scmp.eq.s32.totalorder %s1338_s24, 0 }
  0x4f   : > { %p1719_p5 = scmp.eq.s32.totalorder %s1407_s25, 1  ;;  %p1100_p9 = scmp.lt.s32.totalorder %s1338_s24, 2 }
  0x50   : > { %s1508_s13 = scalar_select %p31_p13, %s1334_s23, %s33_s12  }
  0x51   : > { %p42_p3 = por %p41_p10, %p40_p6  ;;  %p1512_p7 = por %p1719_p5, %p40_p6 }
  0x52   : > { %s238_s8 = sand.u32 1, %s1334_s23   ;;  %s884_s10 = sshll.u32 %s1338_s24, 8 }
  0x53   : > { %s1720_s14 = scalar_select %p1512_p7, 1, 0 }
  0x54   : > { %s863_s15 = sshll.u32 %s238_s8, 4  ;;  %s1721_s0 = sld [smem:[#allocation16_spill]] }
  0x55   : > { %s242_s18 = scalar_lea.vmem [#allocation2], %s863_s15  ;;  %p1526_p11 = pnand %p1100_p9, %p42_p3 }
  0x56   : > { %s249_s26 = sshll.u32 %s242_s18, 4  ;;  %s1533_s16 = scalar_lea.hbm %s1697_s1, %s884_s10  ;;  %s1524_s26 = int_to_ptr.vmem [resolvable:$true] %s249_s26 }
  0x57   : > { %s263_s7 = scalar_lea.vmem [#allocation5], %s863_s15  ;;  %s1537_s20 = scalar_lea.sflag [#allocation3], %s238_s8 }
  0x58   : > { %s1535_s19 = sshll.u32 %s263_s7, 4  ;;  %p1202_p0 = pneg %p1526_p11  ;;  %s1569_s19 = int_to_ptr.vmem [resolvable:$true] %s1535_s19 }
  0x5a   : > { %s1522_s17 = scalar_lea.hbm %s1721_s0, %s884_s10  ;;  %s1205_s11 = scalar_lea.hbm %s1721_s0, 512 }
  0x5b   : > { %s1200_s18 = scalar_lea.hbm %s1522_s17, 256  ;;  %p1206_p13 = scmp.lt.u32.totalorder %s1522_s17, %s1721_s0 }
  0x5c   : > { %p1201_p12 = scmp.ne.s32.totalorder %s1522_s17, %s1200_s18  ;;  %p1207_p6 = scmp.lt.u32.totalorder %s1205_s11, %s1200_s18 }
  0x5d   : > { %p1209_p3 = scmp.lt.u32.totalorder %s1200_s18, %s1522_s17 }
  0x5e   : > { %p1203_p1 = pnand %p1202_p0, %p1201_p12  ;;  %p1208_p10 = por %p1207_p6, %p1206_p13 }
  0x60   : > { %p1204_p2 = pneg %p1203_p1  ;;  %p1210_p5 = por %p1209_p3, %p1208_p10 }
  0x62   : > { %p1211_p9 = pnand %p1210_p5, %p1204_p2 }
  0x64   : > { %1214 = shalt.err (!%p1211_p9)
}
  0x65   : > { %s1215_s8 = scalar_lea.vmem %s1524_s26, 256  ;;  %s1346_s2 = smov [#allocation2]  }
  0x66   : > { %p1216_p12 = scmp.ne.s32.totalorder %s1524_s26, %s1215_s8  ;;  %s1220_s4 = sshll.u32 %s1346_s2, 4  ;;  %s1221_s4 = int_to_ptr.vmem [resolvable:$false] %s1220_s4 }
  0x67   : > { %s1222_s15 = scalar_lea.vmem %s1221_s4, 512  ;;  %p1223_p4 = scmp.lt.s32.totalorder %s1524_s26, %s1221_s4 }
  0x68   : > { %p1218_p1 = pnand %p1216_p12, %p1202_p0  ;;  %p1224_p13 = scmp.lt.s32.totalorder %s1222_s15, %s1215_s8 }
  0x6a   : > { %p1219_p7 = pneg %p1218_p1  ;;  %p1225_p6 = por %p1224_p13, %p1223_p4 }
  0x6c   : > { %p1226_p10 = pnand %p1225_p6, %p1219_p7 }
  0x6e   : > { %1229 = shalt.err (!%p1226_p10)
}
  0x6f   : > { %s1723_s7 = smov 8   ;;  %s1724_s18 = smov 128  }
  0x70   : > { %1090 = dma.hbm_to_vmem [thread:$0]  (!%p1526_p11), %s1522_s17, 256, %s1524_s26, %s1537_s20, %s1724_s18, %s1724_s18, %s1723_s7  }
  0x71   : > { %s259_s11 = sand.u32 1, %s1338_s24   ;;  %s1230_s10 = scalar_lea.hbm %s1533_s16, 256 }
  0x72   : > { %s1572_s12 = scalar_lea.sflag [#allocation6], %s259_s11  ;;  %p1231_p4 = scmp.ne.s32.totalorder %s1533_s16, %s1230_s10 }
  0x73   : > { %s1235_s4 = scalar_lea.hbm %s1697_s1, 512  ;;  %p1236_p3 = scmp.lt.u32.totalorder %s1533_s16, %s1697_s1 }
  0x74   : > { %p1233_p7 = pnand %p1231_p4, %p1202_p0  ;;  %p1237_p5 = scmp.lt.u32.totalorder %s1235_s4, %s1230_s10 }
  0x75   : > { %p1239_p12 = scmp.lt.u32.totalorder %s1230_s10, %s1533_s16 }
  0x76   : > { %p1234_p2 = pneg %p1233_p7  ;;  %p1238_p9 = por %p1237_p5, %p1236_p3 }
  0x78   : > { %p1240_p1 = por %p1239_p12, %p1238_p9 }
  0x7a   : > { %p1241_p13 = pnand %p1240_p1, %p1234_p2 }
  0x7c   : > { %1244 = shalt.err (!%p1241_p13)
}
  0x7d   : > { %s1245_s20 = scalar_lea.vmem %s1569_s19, 256  ;;  %s1347_s17 = smov [#allocation5]  }
  0x7e   : > { %p1246_p6 = scmp.ne.s32.totalorder %s1569_s19, %s1245_s20  ;;  %s1250_s26 = sshll.u32 %s1347_s17, 4  ;;  %s1251_s26 = int_to_ptr.vmem [resolvable:$false] %s1250_s26 }
  0x7f   : > { %s1252_s0 = scalar_lea.vmem %s1251_s26, 512  ;;  %p1253_p7 = scmp.lt.s32.totalorder %s1569_s19, %s1251_s26 }
  0x80   : > { %p1248_p10 = pnand %p1246_p6, %p1202_p0  ;;  %p1254_p3 = scmp.lt.s32.totalorder %s1252_s0, %s1245_s20 }
  0x82   : > { %p1249_p4 = pneg %p1248_p10  ;;  %p1255_p5 = por %p1254_p3, %p1253_p7 }
  0x84   : > { %p1256_p9 = pnand %p1255_p5, %p1249_p4 }
  0x86   : > { %1259 = shalt.err (!%p1256_p9)
}
  0x87   : > { %1093 = dma.hbm_to_vmem [thread:$0]  (!%p1526_p11), %s1533_s16, 256, %s1569_s19, %s1572_s12, %s1724_s18, %s1724_s18, %s1723_s7  }
  0x88   : > { %282 = sbr.rel (%p1426_p8) target bundleno = 632 (0x278), region = 44  ;;  %s1604_s11 = sand.u32 (!%p1426_p8), 1, %s1330_s22  }
  0x89   : > { %s1607_s10 = sshll.u32 (!%p1426_p8), %s1604_s11, 4  ;;  %s285_s30 = scalar_lea.sflag (!%p1426_p8), [#allocation3], %s1604_s11 }
  0x8a   : > { %s288_s8 = scalar_lea.vmem (!%p1426_p8), [#allocation2], %s1607_s10  ;;  %p1725_p0 = scmp.ne.s32.totalorder (!%p1426_p8), %s1713_s27, 0 }
  0x8f   : > { %1305 = dma.done.wait (%p1725_p0), %s285_s30, 256  }
  0x90   : > { %1307 = vsyncadd (%p1725_p0), %s285_s30, 4294967040  ;;  %s293_s29 = sand.u32 1, %s1407_s25   ;;  %s297_s16 = scalar_lea.vmem [#allocation5], %s1607_s10 }
  0x91   : > { %s294_s19 = scalar_lea.sflag [#allocation6], %s293_s29 }
  0x92   : > { %1309 = dma.done.wait (%p1725_p0), %s294_s19, 256  }
  0x93   : > { %1311 = vsyncadd (%p1725_p0), %s294_s19, 4294967040  ;;  %p1726_p8 = scmp.eq.s32.totalorder %s1407_s25, 0 }
  0x95   : > { %1313 = dma.done.wait (%p1726_p8), [#allocation6], 1024   ;;  %p1727_p11 = pmov %p1726_p8 }
  0x96   : > { %p1728_p2 = pmov %p1726_p8 }
  0x97   : > { %1315 = vsyncadd (%p1727_p11), [#allocation6], 4294966272 }
  0x98   : > { %1317 = dma.done.wait (%p1728_p2), [#allocation9], 12288   ;;  %p1729_p12 = pmov %p1728_p2 }
  0x99   : > { %v345_v0 = vld [vmem:[#allocation7] sm:$0xff]  ;;  %v346_v1 = vld [vmem:[#allocation7 + $0x8] sm:$0xff]  ;;  %v347_v2 = vld [vmem:[#allocation7 + $0x10] sm:$0xff]  ;;  %vm360_vm0 = vcmask 523264   ;;  %vm696_vm1 = vcmask 1040384   ;;  %vm705_vm2 = vcmask 1046528  }
  0x9a   : > { %1319 = vsyncadd (%p1729_p12), [#allocation9], 4294955008  ;;  %v954_v3 = vpack.c.bf16 %v346_v1, %v345_v0  ;;  %v348_v4 = vld [vmem:[#allocation7 + $0x18] sm:$0xff]  ;;  %v349_v6 = vld [vmem:[#allocation7 + $0x20] sm:$0xff]  ;;  %s338_s18 = scalar_lea.vmem [#allocation10], %s1607_s10  ;;  %s886_s15 = sshll.u32 %s1407_s25, 8 }
  0x9b   : > { %v958_v5 = vpack.c.bf16 %v348_v4, %v347_v2  ;;  %v350_v7 = vld [vmem:[#allocation7 + $0x28] sm:$0xff]  ;;  %v341_v8 = vld [vmem:[%s297_s16] sm:$0xff]  ;;  %v449_v15 = vld [vmem:[#allocation8 + $0x18] sm:$0xff]  ;;  %s743_s12 = sshll.u32 %s338_s18, 4  ;;  %s1652_s26 = scalar_lea.hbm %s1702_s6, %s886_s15  ;;  %s1647_s12 = int_to_ptr.vmem [resolvable:$true] %s743_s12 }
  0x9c   : > { %955 = vmatprep.subr.bf16.mxu0 %v954_v3  ;;  %v343_v9 = vmax.f32 %v341_v8, 0.0  ;;  %v447_v10 = vld [vmem:[#allocation8 + $0x8] sm:$0xff]  ;;  %v450_v11 = vld [vmem:[#allocation8 + $0x20] sm:$0xff]  ;;  %v351_v12 = vld [vmem:[#allocation7 + $0x30] sm:$0xff]  ;;  %v962_v17 = vpack.c.bf16 %v350_v7, %v349_v6  ;;  %s730_s0 = scalar_lea.sflag [#allocation4], %s1604_s11  ;;  %s1260_s10 = scalar_lea.vmem %s1647_s12, 256 }
  0x9d   : > { %957 = vmatpush3.bf16.msra.mxu0 %v954_v3  ;;  %v970_v13 = vpack.c.bf16 %v450_v11, %v447_v10  ;;  %v446_v14 = vld [vmem:[#allocation8] sm:$0xff]  ;;  %v453_v16 = vld [vmem:[#allocation8 + $0x38] sm:$0xff]  ;;  %v456_v19 = vld [vmem:[#allocation8 + $0x50] sm:$0xff]  ;;  %p1261_p1 = scmp.ne.s32.totalorder %s1647_s12, %s1260_s10  ;;  %p1730_p13 = scmp.ne.s32.totalorder %s1720_s14, 0 }
  0x9e   : > { %959 = vmatprep.subr.bf16.mxu0 %v958_v5  ;;  %951 = vmatprep.mubr.msk.f32.mxu0 %vm360_vm0, %v343_v9  ;;  %v972_v18 = vpack.c.bf16 %v449_v15, %v446_v14  ;;  %v452_v20 = vld [vmem:[#allocation8 + $0x30] sm:$0xff]  ;;  %v455_v21 = vld [vmem:[#allocation8 + $0x48] sm:$0xff]  ;;  %v352_v22 = vld [vmem:[#allocation7 + $0x38] sm:$0xff]  ;;  %v974_v23 = vpack.c.bf16 %v456_v19, %v453_v16  ;;  %s1348_s25 = smov [#allocation10]  }
  0x9f   : > { %971 = vmatprep.subr.bf16.mxu1 %v970_v13  ;;  %v459_v24 = vld [vmem:[#allocation8 + $0x68] sm:$0xff]  ;;  %v462_v25 = vld [vmem:[#allocation8 + $0x80] sm:$0xff]  ;;  %v976_v26 = vpack.c.bf16 %v455_v21, %v452_v20  ;;  %v461_v29 = vld [vmem:[#allocation8 + $0x78] sm:$0xff]  ;;  %v966_v30 = vpack.c.bf16 %v352_v22, %v351_v12  ;;  %p1262_p6 = pnand %p1261_p1, %p1730_p13  ;;  %s1264_s30 = sshll.u32 %s1348_s25, 4  ;;  %s1265_s30 = int_to_ptr.vmem [resolvable:$false] %s1264_s30 }
  0xa0   : > { %973 = vmatpush1.bf16.msra.mxu1 %v972_v18  ;;  %v978_v27 = vpack.c.bf16 %v462_v25, %v459_v24  ;;  %v458_v28 = vld [vmem:[#allocation8 + $0x60] sm:$0xff]  ;;  %v465_v31 = vld [vmem:[#allocation8 + $0x98] sm:$0xff]  ;;  %v468_v32 = vld [vmem:[#allocation8 + $0xb0] sm:$0xff]  ;;  %p1267_p4 = scmp.lt.s32.totalorder %s1647_s12, %s1265_s30 }
  0xa1   : > { %961 = vmatpush3.bf16.msra.mxu0 %v958_v5  ;;  %975 = vmatprep.subr.bf16.mxu1 %v974_v23  ;;  %v980_v33 = vpack.c.bf16 %v461_v29, %v458_v28  ;;  %v342_v34 = vld [vmem:[%s297_s16 + $0x8] sm:$0xff]  ;;  %v982_v35 = vpack.c.bf16 %v468_v32, %v465_v31  ;;  %v464_v36 = vld [vmem:[#allocation8 + $0x90] sm:$0xff]  ;;  %v474_v39 = vld [vmem:[#allocation8 + $0xe0] sm:$0xff]  ;;  %p1263_p10 = pneg %p1262_p6 }
  0xa2   : > { %963 = vmatprep.subr.bf16.mxu0 %v962_v17  ;;  %v467_v37 = vld [vmem:[#allocation8 + $0xa8] sm:$0xff]  ;;  %v496_v40 = vld [vmem:[#allocation8 + $0x190] sm:$0xff]  ;;  %v344_v41 = vmax.f32 %v342_v34, 0.0  ;;  %v470_v43 = vld [vmem:[#allocation8 + $0xc0] sm:$0xff] }
  0xa3   : > { %v471_v38 = vld [vmem:[#allocation8 + $0xc8] sm:$0xff]  ;;  %v984_v42 = vpack.c.bf16 %v467_v37, %v464_v36  ;;  %v473_v44 = vld [vmem:[#allocation8 + $0xd8] sm:$0xff]  ;;  %v448_v49 = vld [vmem:[#allocation8 + $0x10] sm:$0xff] }
  0xa4   : > { %977 = vmatpush1.bf16.msra.mxu1 %v976_v26  ;;  %v499_v45 = vld [vmem:[#allocation8 + $0x1a8] sm:$0xff]  ;;  %v986_v46 = vpack.c.bf16 %v474_v39, %v471_v38  ;;  %v477_v47 = vld [vmem:[#allocation8 + $0xf8] sm:$0xff]  ;;  %v480_v51 = vld [vmem:[#allocation8 + $0x110] sm:$0xff]  ;;  %v988_v57 = vpack.c.bf16 %v473_v44, %v470_v43 }
  0xa5   : > { %965 = vmatpush3.bf16.msra.mxu0 %v962_v17  ;;  %979 = vmatprep.subr.bf16.mxu1 %v978_v27  ;;  %v1034_v48 = vpack.c.bf16 %v499_v45, %v496_v40  ;;  %v451_v50 = vld [vmem:[#allocation8 + $0x28] sm:$0xff]  ;;  %v502_v53 = vld [vmem:[#allocation8 + $0x1c0] sm:$0xff]  ;;  %v505_v54 = vld [vmem:[#allocation8 + $0x1d8] sm:$0xff]  ;;  %v990_v61 = vpack.c.bf16 %v480_v51, %v477_v47 }
  0xa6   : > { %967 = vmatprep.subr.bf16.mxu0 %v966_v30  ;;  %v1036_v52 = vpack.c.bf16 %v451_v50, %v448_v49  ;;  %v1038_v55 = vpack.c.bf16 %v505_v54, %v502_v53  ;;  %v454_v56 = vld [vmem:[#allocation8 + $0x40] sm:$0xff]  ;;  %v476_v58 = vld [vmem:[#allocation8 + $0xf0] sm:$0xff]  ;;  %v479_v59 = vld [vmem:[#allocation8 + $0x108] sm:$0xff] }
  0xa7   : > { %v457_v60 = vld [vmem:[#allocation8 + $0x58] sm:$0xff]  ;;  %v483_v62 = vld [vmem:[#allocation8 + $0x128] sm:$0xff]  ;;  %v508_v0 = vld [vmem:[#allocation8 + $0x1f0] sm:$0xff]  ;;  %v992_v7 = vpack.c.bf16 %v479_v59, %v476_v58 }
  0xa8   : > { %981 = vmatpush1.bf16.msra.mxu1 %v980_v33  ;;  %v1040_v63 = vpack.c.bf16 %v457_v60, %v454_v56  ;;  %v511_v1 = vld [vmem:[#allocation8 + $0x208] sm:$0xff]  ;;  %v486_v2 = vld [vmem:[#allocation8 + $0x140] sm:$0xff]  ;;  %v460_v4 = vld [vmem:[#allocation8 + $0x70] sm:$0xff] }
  0xa9   : > { %969 = vmatpush3.bf16.msra.mxu0 %v966_v30  ;;  %983 = vmatprep.subr.bf16.mxu1 %v982_v35  ;;  %v1042_v3 = vpack.c.bf16 %v511_v1, %v508_v0  ;;  %v463_v5 = vld [vmem:[#allocation8 + $0x88] sm:$0xff]  ;;  %v514_v6 = vld [vmem:[#allocation8 + $0x220] sm:$0xff]  ;;  %v517_v8 = vld [vmem:[#allocation8 + $0x238] sm:$0xff]  ;;  %v994_v9 = vpack.c.bf16 %v486_v2, %v483_v62 }
  0xaa   : > { %1035 = vmatprep.subr.bf16.mxu0 %v1034_v48  ;;  %v482_v10 = vld [vmem:[#allocation8 + $0x120] sm:$0xff]  ;;  %v485_v11 = vld [vmem:[#allocation8 + $0x138] sm:$0xff]  ;;  %v1044_v13 = vpack.c.bf16 %v463_v5, %v460_v4  ;;  %v492_v14 = vld [vmem:[#allocation8 + $0x170] sm:$0xff]  ;;  %v1046_v15 = vpack.c.bf16 %v517_v8, %v514_v6 }
  0xab   : > { %v489_v12 = vld [vmem:[#allocation8 + $0x158] sm:$0xff]  ;;  %v466_v16 = vld [vmem:[#allocation8 + $0xa0] sm:$0xff]  ;;  %v520_v18 = vld [vmem:[#allocation8 + $0x250] sm:$0xff]  ;;  %v996_v20 = vpack.c.bf16 %v485_v11, %v482_v10 }
  0xac   : > { %952 = vmatmul.mubr.msk.f32.vlgmr.msra.gmra.mrb[0].mxu0 %vm360_vm0, %v344_v41  ;;  %985 = vmatpush1.bf16.msra.mxu1 %v984_v42  ;;  %v469_v17 = vld [vmem:[#allocation8 + $0xb8] sm:$0xff]  ;;  %v523_v19 = vld [vmem:[#allocation8 + $0x268] sm:$0xff]  ;;  %v998_v21 = vpack.c.bf16 %v492_v14, %v489_v12  ;;  %v488_v22 = vld [vmem:[#allocation8 + $0x150] sm:$0xff] }
  0xad   : > { %987 = vmatprep.subr.bf16.mxu1 %v986_v46  ;;  %1037 = vmatpush3.bf16.msra.mxu0 %v1036_v52  ;;  %v491_v23 = vld [vmem:[#allocation8 + $0x168] sm:$0xff]  ;;  %v1048_v25 = vpack.c.bf16 %v469_v17, %v466_v16  ;;  %v498_v26 = vld [vmem:[#allocation8 + $0x1a0] sm:$0xff]  ;;  %v1050_v27 = vpack.c.bf16 %v523_v19, %v520_v18  ;;  %v472_v28 = vld [vmem:[#allocation8 + $0xd0] sm:$0xff] }
  0xae   : > { %1039 = vmatprep.subr.bf16.mxu0 %v1038_v55  ;;  %v495_v24 = vld [vmem:[#allocation8 + $0x188] sm:$0xff]  ;;  %v526_v30 = vld [vmem:[#allocation8 + $0x280] sm:$0xff]  ;;  %v529_v31 = vld [vmem:[#allocation8 + $0x298] sm:$0xff]  ;;  %v1000_v32 = vpack.c.bf16 %v491_v23, %v488_v22 }
  0xaf   : > { %v475_v29 = vld [vmem:[#allocation8 + $0xe8] sm:$0xff]  ;;  %v1002_v33 = vpack.c.bf16 %v498_v26, %v495_v24  ;;  %v494_v34 = vld [vmem:[#allocation8 + $0x180] sm:$0xff]  ;;  %v497_v35 = vld [vmem:[#allocation8 + $0x198] sm:$0xff]  ;;  %v1054_v39 = vpack.c.bf16 %v529_v31, %v526_v30 }
  0xb0   : > { %989 = vmatpush1.bf16.msra.mxu1 %v988_v57  ;;  %v501_v36 = vld [vmem:[#allocation8 + $0x1b8] sm:$0xff]  ;;  %v1052_v37 = vpack.c.bf16 %v475_v29, %v472_v28  ;;  %v504_v38 = vld [vmem:[#allocation8 + $0x1d0] sm:$0xff]  ;;  %v478_v40 = vld [vmem:[#allocation8 + $0x100] sm:$0xff]  ;;  %v1004_v44 = vpack.c.bf16 %v497_v35, %v494_v34 }
  0xb1   : > { %991 = vmatprep.subr.bf16.mxu1 %v990_v61  ;;  %1041 = vmatpush3.bf16.msra.mxu0 %v1040_v63  ;;  %v481_v41 = vld [vmem:[#allocation8 + $0x118] sm:$0xff]  ;;  %v532_v42 = vld [vmem:[#allocation8 + $0x2b0] sm:$0xff]  ;;  %v535_v43 = vld [vmem:[#allocation8 + $0x2c8] sm:$0xff]  ;;  %v1006_v45 = vpack.c.bf16 %v504_v38, %v501_v36 }
  0xb2   : > { %1043 = vmatprep.subr.bf16.mxu0 %v1042_v3  ;;  %v500_v46 = vld [vmem:[#allocation8 + $0x1b0] sm:$0xff]  ;;  %v503_v47 = vld [vmem:[#allocation8 + $0x1c8] sm:$0xff]  ;;  %v1056_v48 = vpack.c.bf16 %v481_v41, %v478_v40  ;;  %v510_v50 = vld [vmem:[#allocation8 + $0x200] sm:$0xff]  ;;  %v1058_v51 = vpack.c.bf16 %v535_v43, %v532_v42 }
  0xb3   : > { %v507_v49 = vld [vmem:[#allocation8 + $0x1e8] sm:$0xff]  ;;  %v1008_v52 = vpack.c.bf16 %v503_v47, %v500_v46  ;;  %v506_v54 = vld [vmem:[#allocation8 + $0x1e0] sm:$0xff]  ;;  %v509_v55 = vld [vmem:[#allocation8 + $0x1f8] sm:$0xff] }
  0xb4   : > { %993 = vmatpush1.bf16.msra.mxu1 %v992_v7  ;;  %v1010_v53 = vpack.c.bf16 %v510_v50, %v507_v49  ;;  %v513_v56 = vld [vmem:[#allocation8 + $0x218] sm:$0xff]  ;;  %v516_v57 = vld [vmem:[#allocation8 + $0x230] sm:$0xff]  ;;  %v1012_v58 = vpack.c.bf16 %v509_v55, %v506_v54  ;;  %v515_v61 = vld [vmem:[#allocation8 + $0x228] sm:$0xff] }
  0xb5   : > { %995 = vmatprep.subr.bf16.mxu1 %v994_v9  ;;  %1045 = vmatpush3.bf16.msra.mxu0 %v1044_v13  ;;  %v1014_v59 = vpack.c.bf16 %v516_v57, %v513_v56  ;;  %v512_v60 = vld [vmem:[#allocation8 + $0x210] sm:$0xff]  ;;  %v519_v62 = vld [vmem:[#allocation8 + $0x248] sm:$0xff]  ;;  %v522_v63 = vld [vmem:[#allocation8 + $0x260] sm:$0xff] }
  0xb6   : > { %1047 = vmatprep.subr.bf16.mxu0 %v1046_v15  ;;  %v1016_v0 = vpack.c.bf16 %v515_v61, %v512_v60  ;;  %v1018_v1 = vpack.c.bf16 %v522_v63, %v519_v62  ;;  %v518_v2 = vld [vmem:[#allocation8 + $0x240] sm:$0xff]  ;;  %v521_v3 = vld [vmem:[#allocation8 + $0x258] sm:$0xff]  ;;  %v528_v5 = vld [vmem:[#allocation8 + $0x290] sm:$0xff] }
  0xb7   : > { %v525_v4 = vld [vmem:[#allocation8 + $0x278] sm:$0xff]  ;;  %v1020_v6 = vpack.c.bf16 %v521_v3, %v518_v2  ;;  %v524_v8 = vld [vmem:[#allocation8 + $0x270] sm:$0xff]  ;;  %v527_v9 = vld [vmem:[#allocation8 + $0x288] sm:$0xff] }
  0xb8   : > { %997 = vmatpush1.bf16.msra.mxu1 %v996_v20  ;;  %v1022_v7 = vpack.c.bf16 %v528_v5, %v525_v4  ;;  %v531_v10 = vld [vmem:[#allocation8 + $0x2a8] sm:$0xff]  ;;  %v534_v11 = vld [vmem:[#allocation8 + $0x2c0] sm:$0xff]  ;;  %v1024_v12 = vpack.c.bf16 %v527_v9, %v524_v8  ;;  %v533_v15 = vld [vmem:[#allocation8 + $0x2b8] sm:$0xff] }
  0xb9   : > { %999 = vmatprep.subr.bf16.mxu1 %v998_v21  ;;  %1049 = vmatpush3.bf16.msra.mxu0 %v1048_v25  ;;  %v1026_v13 = vpack.c.bf16 %v534_v11, %v531_v10  ;;  %v530_v14 = vld [vmem:[#allocation8 + $0x2a0] sm:$0xff]  ;;  %v484_v16 = vld [vmem:[#allocation8 + $0x130] sm:$0xff]  ;;  %v487_v18 = vld [vmem:[#allocation8 + $0x148] sm:$0xff] }
  0xba   : > { %1051 = vmatprep.subr.bf16.mxu0 %v1050_v27  ;;  %v1028_v17 = vpack.c.bf16 %v533_v15, %v530_v14  ;;  %v1060_v19 = vpack.c.bf16 %v487_v18, %v484_v16  ;;  %v537_v20 = vld [vmem:[#allocation8 + $0x2d8] sm:$0xff]  ;;  %v540_v21 = vld [vmem:[#allocation8 + $0x2f0] sm:$0xff]  ;;  %v538_v23 = vld [vmem:[#allocation8 + $0x2e0] sm:$0xff] }
  0xbb   : > { %v1030_v22 = vpack.c.bf16 %v540_v21, %v537_v20  ;;  %v541_v24 = vld [vmem:[#allocation8 + $0x2f8] sm:$0xff]  ;;  %v536_v25 = vld [vmem:[#allocation8 + $0x2d0] sm:$0xff]  ;;  %v539_v27 = vld [vmem:[#allocation8 + $0x2e8] sm:$0xff] }
  0xbc   : > { %1001 = vmatpush1.bf16.msra.mxu1 %v1000_v32  ;;  %v1062_v26 = vpack.c.bf16 %v541_v24, %v538_v23  ;;  %v490_v28 = vld [vmem:[#allocation8 + $0x160] sm:$0xff]  ;;  %v493_v29 = vld [vmem:[#allocation8 + $0x178] sm:$0xff]  ;;  %v1032_v30 = vpack.c.bf16 %v539_v27, %v536_v25 }
  0xbd   : > { %1003 = vmatprep.subr.bf16.mxu1 %v1002_v33  ;;  %1053 = vmatpush3.bf16.msra.mxu0 %v1052_v37  ;;  %v1064_v31 = vpack.c.bf16 %v493_v29, %v490_v28  ;;  %v875_v32 = vld [vmem:[%s1699_s3] ss:$0 sm:$0xff]  ;;  %v340_v40 = vld [vmem:[%s288_s8 + $0x8] sm:$0xff] }
  0xbe   : > { %1055 = vmatprep.subr.bf16.mxu0 %v1054_v39  ;;  %v339_v34 = vld [vmem:[%s288_s8] sm:$0xff]  ;;  %v443_v42 = vmax.f32 %v340_v40, 0.0  ;;  %s1266_s8 = scalar_lea.vmem %s1265_s30, 512 }
  0xbf   : > { %v442_v38 = vmax.f32 %v339_v34, 0.0  ;;  %p1268_p7 = scmp.lt.s32.totalorder %s1266_s8, %s1260_s10 }
  0xc0   : > { %1005 = vmatpush1.bf16.msra.mxu1 %v1004_v44 }
  0xc1   : > { %1007 = vmatprep.subr.bf16.mxu1 %v1006_v45  ;;  %1057 = vmatpush3.bf16.msra.mxu0 %v1056_v48  ;;  %p1269_p3 = por %p1268_p7, %p1267_p4 }
  0xc2   : > { %1059 = vmatprep.subr.bf16.mxu0 %v1058_v51 }
  0xc3   : > { %p1270_p5 = pnand %p1269_p3, %p1263_p10 }
  0xc4   : > { %1009 = vmatpush1.bf16.msra.mxu1 %v1008_v52 }
  0xc5   : > { %1011 = vmatprep.subr.bf16.mxu1 %v1010_v53  ;;  %1061 = vmatpush3.bf16.msra.mxu0 %v1060_v19 }
  0xc6   : > { %1063 = vmatprep.subr.bf16.mxu0 %v1062_v26 }
  0xc8   : > { %1013 = vmatpush1.bf16.msra.mxu1 %v1012_v58 }
  0xc9   : > { %1015 = vmatprep.subr.bf16.mxu1 %v1014_v59  ;;  %1065 = vmatpush3.bf16.msra.mxu0 %v1064_v31 }
  0xcc   : > { %1017 = vmatpush1.bf16.msra.mxu1 %v1016_v0 }
  0xcd   : > { %1019 = vmatprep.subr.bf16.mxu1 %v1018_v1  ;;  %v878_v1 = vld [vmem:[%s1701_s5] ss:$0 sm:$0xff] }
  0xd0   : > { %1021 = vmatpush1.bf16.msra.mxu1 %v1020_v6 }
  0xd1   : > { %1023 = vmatprep.subr.bf16.mxu1 %v1022_v7 }
  0xd4   : > { %1025 = vmatpush1.bf16.msra.mxu1 %v1024_v12 }
  0xd5   : > { %1027 = vmatprep.subr.bf16.mxu1 %v1026_v13 }
  0xd8   : > { %1029 = vmatpush1.bf16.msra.mxu1 %v1028_v17 }
  0xd9   : > { %1031 = vmatprep.subr.bf16.mxu1 %v1030_v22 }
  0xdc   : > { %1033 = vmatpush1.bf16.msra.mxu1 %v1032_v30 }
 0x17f   : > { %v953_v33 = vpop.f32.mrb[0].mxu0 }
 0x180   : > { %v433_v35 = vpop.f32.mrb[1].mxu0  ;;  %v439_v36 = vadd.f32 %v953_v33, %v875_v32 }
 0x181   : > { %v434_v37 = vadd.f32 %v875_v32, %v433_v35 }
 0x182   : > { %v445_v41 = vmax.f32 %v439_v36, 0.0 }
 0x183   : > { %v444_v39 = vmax.f32 %v434_v37, 0.0 }
 0x185   : > { %606 = vmatprep.mubr.f32.mxu1 %v444_v39  ;;  %683 = vmatprep.mubr.f32.mxu0 %v444_v39 }
 0x186   : > { %607 = vmatmul.mubr.f32.vlgmr.msra.gmra.mrb[0].mxu1 %v442_v38  ;;  %684 = vmatmul.mubr.f32.vlgmr.msra.gmra.mrb[2].mxu0 %v442_v38 }
 0x187   : > { %612 = vmatprep.mubr.f32.mxu1 %v445_v41  ;;  %688 = vmatprep.mubr.f32.mxu0 %v445_v41 }
 0x18a   : > { %613 = vmatmul.mubr.f32.gmra.mrb[2].mxu1 %v443_v42  ;;  %689 = vmatmul.mubr.f32.gmra.mrb[4].mxu0 %v443_v42 }
 0x259   : > { %v608_v43 = vpop.f32.mrb[0].mxu1  ;;  %v929_v44 = vpop.f32.mrb[2].mxu0 }
 0x25a   : > { %v697_v45 = vrot.slane %v608_v43, 7  ;;  %v610_v46 = vpop.f32.mrb[1].mxu1  ;;  %v930_v47 = vpop.f32.mrb[3].mxu0 }
 0x25b   : > { %v931_v48 = vadd.f32 %v930_v47, %v929_v44 }
 0x25c   : > { %v702_v49 = vsel %vm696_vm1, 0.0, %v697_v45 }
 0x25d   : > { %v712_v50 = vadd.f32 %v702_v49, %v339_v34  ;;  %v614_v51 = vpop.f32.mrb[2].mxu1  ;;  %v932_v52 = vpop.f32.mrb[4].mxu0  ;;  %v706_v59 = vrot.slane %v931_v48, 1 }
 0x25e   : > { %v698_v53 = vrot.slane %v614_v51, 7  ;;  %v616_v54 = vpop.f32.mrb[3].mxu1  ;;  %v933_v55 = vpop.f32.mrb[5].mxu0 }
 0x25f   : > { %v714_v56 = vadd.f32 %v712_v50, %v610_v46  ;;  %v934_v57 = vadd.f32 %v933_v55, %v932_v52 }
 0x260   : > { %v699_v58 = vsel %vm696_vm1, %v697_v45, %v698_v53 }
 0x261   : > { %v713_v60 = vadd.f32 %v699_v58, %v340_v40  ;;  %v707_v61 = vrot.slane %v934_v57, 1 }
 0x263   : > { %v715_v62 = vadd.f32 %v713_v60, %v616_v54  ;;  %v708_v63 = vsel %vm705_vm2, %v706_v59, %v707_v61  ;;  %v711_v0 = vsel %vm705_vm2, %v707_v61, 0.0 }
 0x264   : > { %v716_v2 = vadd.f32 %v714_v56, %v708_v63 }
 0x265   : > { %v717_v3 = vadd.f32 %v715_v62, %v711_v0 }
 0x266   : > { %v725_v4 = vadd.f32 %v878_v1, %v716_v2 }
 0x267   : > { %v726_v5 = vadd.f32 %v878_v1, %v717_v3 }
 0x268   : > { %727 = vst [vmem:[%s338_s18] sm:$0xff] %v725_v4 }
 0x269   : > { %728 = vst [vmem:[%s338_s18 + $0x8] sm:$0xff] %v726_v5 }
 0x26a   : > { %1273 = shalt.err (!%p1270_p5)
}
 0x26b   : > { %s1274_s29 = scalar_lea.hbm %s1652_s26, 256  ;;  %s1278_s27 = scalar_lea.hbm %s1702_s6, 512 }
 0x26c   : > { %p1275_p9 = scmp.ne.s32.totalorder %s1652_s26, %s1274_s29  ;;  %p1279_p11 = scmp.lt.u32.totalorder %s1652_s26, %s1702_s6 }
 0x26d   : > { %p1280_p2 = scmp.lt.u32.totalorder %s1278_s27, %s1274_s29  ;;  %p1282_p1 = scmp.lt.u32.totalorder %s1274_s29, %s1652_s26 }
 0x26e   : > { %p1276_p0 = pnand %p1275_p9, %p1730_p13 }
 0x26f   : > { %p1281_p12 = por %p1280_p2, %p1279_p11 }
 0x270   : > { %p1277_p8 = pneg %p1276_p0 }
 0x271   : > { %p1283_p6 = por %p1282_p1, %p1281_p12 }
 0x273   : > { %p1284_p10 = pnand %p1283_p6, %p1277_p8 }
 0x275   : > { %1287 = shalt.err (!%p1284_p10)
}
 0x276   : > { %s1349_s2 = smov 128   ;;  %s1350_s4 = smov 8  }
 0x277   : > { %1078 = dma.vmem_to_hbm [thread:$0]  (%p1730_p13), %s1647_s12, 256, %s1652_s26, %s730_s0, %s1349_s2, %s1349_s2, %s1350_s4  }
 0x278 PF: > { %s758_s15 = sand.u32 1, %s1326_s21   ;;  %p1731_p4 = scmp.ne.s32.totalorder %s1714_s28, 0 }
 0x279   : > { %p1732_p7 = scmp.ge.s32.totalorder %s1338_s24, 2  ;;  %s759_s20 = scalar_lea.sflag [#allocation4], %s758_s15 }
 0x27b   : > { %p1095_p3 = pnand %p1732_p7, %p1731_p4 }
 0x27d   : > { %1321 = dma.done.wait (!%p1095_p3), %s759_s20, 256  }
 0x27e   : > { %1323 = vsyncadd (!%p1095_p3), %s759_s20, 4294967040  ;;  %p23_p5 = scmp.ge.s32.totalorder %s1499_s9, 4   ;;  %s1733_s21 = smov %s1330_s22 }
 0x27f   : > { %s1734_s22 = smov %s1334_s23  ;;  %s1735_s23 = smov %s1508_s13 }
 0x280   : > { %s1736_s24 = smov %s1499_s9  ;;  %25 = sbr.rel (!%p23_p5) target bundleno = 12 (0xc), region = 110 }
 0x287   :  { %764 = vsyncpa [#allocation3], 1 }
 0x288   :  { %766 = vsyncpa [#allocation3 + $0x1], 1 }
 0x289   :  { %767 = vsyncpa [#allocation6], 1 }
 0x28a   :  { %769 = vsyncpa [#allocation6 + $0x1], 1 }
 0x28b   :  { %770 = vsyncpa [#allocation9], 1 }
 0x28c   :  { %771 = vsyncpa [#allocation4], 1 }
 0x28d   :  { %773 = vsyncpa [#allocation4 + $0x1], 1 }

</bundles_post_ra>
